<compile_context>
chip_gen: v7x
topology: tpu7x:2x2x1
jax: 0.10.0
libtpu: 0.0.40
codegen_flags: <defaults>
</compile_context>

<pallas_src>
import functools

import jax
import jax.numpy as jnp
from jax.experimental import pallas as pl
from jax.experimental.pallas import tpu as pltpu


def _round_up(x, m):
    return (x + m - 1) // m * m


def _fusion_kernel(num_modalities, *refs):
    """refs layout:
       [x_0, wfused_0, ..., x_{M-1}, wfused_{M-1}, b_eff, w_final, b_final, out_ref]
    """
    xw = refs[: 2 * num_modalities]
    b_eff_ref, wf_ref, bf_ref, out_ref = refs[2 * num_modalities:]

    # fc2 pre-activation = sum_m x_m @ Wfused_m  (bf16 MXU passes, f32 accumulation)
    acc = jnp.dot(xw[0][...], xw[1][...], preferred_element_type=jnp.float32)
    for m in range(1, num_modalities):
        acc = acc + jnp.dot(xw[2 * m][...], xw[2 * m + 1][...],
                            preferred_element_type=jnp.float32)

    # bias add + ReLU in f32 (implicit broadcast of the (1, H2p) bias)
    z = jnp.maximum(acc + b_eff_ref[...], 0.0)

    # fc_final: bf16 MXU pass, f32 accumulation, f32 bias and store
    out = jnp.dot(z.astype(wf_ref.dtype), wf_ref[...],
                  preferred_element_type=jnp.float32) + bf_ref[...]
    out_ref[...] = out.astype(out_ref.dtype)


def intermediate_fusion_forward(features, params, *, compute_dtype=jnp.bfloat16,
                                max_batch_tile=512):
    """features: list of (B, D_m) float32 arrays.
    params: dict with
      'mod_w' : list of (D_m, H_m) weights   (H_m = D_m // 2)
      'mod_b' : list of (1, H_m) biases
      'w2'    : (sum(H_m), H2) fc2 weight,   'b2': (1, H2)
      'wf'    : (H2, O) fc_final weight,     'bf': (1, O)
    """
    num_mod = len(features)
    B = int(features[0].shape[0])
    d_list = [int(f.shape[1]) for f in features]
    H2 = int(params['w2'].shape[1])
    O = int(params['wf'].shape[1])

    # ---- wrapper-side algebra (f32, exact): fuse modality Linears into fc2 ----
    h_list = [int(w.shape[1]) for w in params['mod_w']]
    offsets = [0]
    for h in h_list:
        offsets.append(offsets[-1] + h)
    w2_slices = [params['w2'][offsets[m]:offsets[m + 1], :] for m in range(num_mod)]
    w_fused = [params['mod_w'][m] @ w2_slices[m] for m in range(num_mod)]      # (D_m, H2)
    b_eff = params['b2'] + sum(params['mod_b'][m] @ w2_slices[m]
                               for m in range(num_mod))                        # (1, H2)

    # ---- pad lane dims to 128, batch to the tile size -------------------------
    H2p = _round_up(H2, 128)
    Op = _round_up(O, 128)
    TB = min(max_batch_tile, _round_up(B, 8))
    B_pad = _round_up(B, TB)

    feats_p = [jnp.pad(f, ((0, B_pad - B), (0, 0))).astype(compute_dtype)
               for f in features]
    wfused_p = [jnp.pad(w, ((0, 0), (0, H2p - H2))).astype(compute_dtype)
                for w in w_fused]
    b_eff_p = jnp.pad(b_eff, ((0, 0), (0, H2p - H2))).astype(jnp.float32)
    wf_p = jnp.pad(params['wf'], ((0, H2p - H2), (0, Op - O))).astype(compute_dtype)
    bf_p = jnp.pad(params['bf'], ((0, 0), (0, Op - O))).astype(jnp.float32)

    # ---- operands + BlockSpecs (explicit index_maps; no late-binding closures) --
    operands = []
    in_specs = []
    for m in range(num_mod):
        operands += [feats_p[m], wfused_p[m]]
        in_specs.append(pl.BlockSpec((TB, d_list[m]), lambda i: (i, 0)))    # batch-tiled
        in_specs.append(pl.BlockSpec((d_list[m], H2p), lambda i: (0, 0)))   # resident
    operands += [b_eff_p, wf_p, bf_p]
    in_specs += [
        pl.BlockSpec((1, H2p), lambda i: (0, 0)),
        pl.BlockSpec((H2p, Op), lambda i: (0, 0)),
        pl.BlockSpec((1, Op), lambda i: (0, 0)),
    ]
    out_spec = pl.BlockSpec((TB, Op), lambda i: (i, 0))

    # ---- cost estimate + generation-safe VMEM sizing ---------------------------
    itemsize = jnp.dtype(compute_dtype).itemsize
    flops = 2 * B_pad * (sum(d_list) * H2p + H2p * Op)
    bytes_accessed = (sum(int(op.size) * op.dtype.itemsize for op in operands)
                      + B_pad * Op * 4)
    tile_bytes = sum(TB * d * itemsize for d in d_list) + TB * Op * 4
    weight_bytes = ((sum(d * H2p for d in d_list) + H2p * Op) * itemsize
                    + (H2p + Op) * 4)
    scratch_bytes = 2 * TB * H2p * 4
    vmem_limit = int(min(max(2 * (2 * tile_bytes + 2 * weight_bytes + scratch_bytes),
                             4 << 20), 48 << 20))   # safe on v7x's 64 MiB VMEM

    kernel = functools.partial(_fusion_kernel, num_mod)
    out_padded = pl.pallas_call(
        kernel,
        out_shape=jax.ShapeDtypeStruct((B_pad, Op), jnp.float32),
        grid=(B_pad // TB,),
        in_specs=in_specs,
        out_specs=out_spec,
        compiler_params=pltpu.CompilerParams(
            dimension_semantics=("parallel",),
            vmem_limit_bytes=vmem_limit),
        cost_estimate=pl.CostEstimate(flops=flops, transcendentals=0,
                                      bytes_accessed=bytes_accessed),
    )(*operands)

    # slice off batch padding rows and lane padding columns
    return out_padded[:B, :O]


def init_params(key, input_sizes, output_size):
    """Deterministic parameter init matching the module's shapes."""
    hidden1 = [d // 2 for d in input_sizes]
    hidden2 = int(sum(hidden1)) // 2

    keys = jax.random.split(key, 2 * len(input_sizes) + 4)
    k_iter = iter(keys)

    mod_w, mod_b = [], []
    for d, h in zip(input_sizes, hidden1):
        mod_w.append(jax.random.normal(next(k_iter), (d, h), jnp.float32) * 0.1)
        mod_b.append(jax.random.normal(next(k_iter), (1, h), jnp.float32) * 0.1)

    w2 = jax.random.normal(next(k_iter), (int(sum(hidden1)), hidden2), jnp.float32) * 0.1
    b2 = jax.random.normal(next(k_iter), (1, hidden2), jnp.float32) * 0.1
    wf = jax.random.normal(next(k_iter), (hidden2, output_size), jnp.float32) * 0.1
    bf = jax.random.normal(next(k_iter), (1, output_size), jnp.float32) * 0.1

    return {'mod_w': mod_w, 'mod_b': mod_b, 'w2': w2, 'b2': b2, 'wf': wf, 'bf': bf}


def reference_forward(features, params):
    """Pure-JAX f32 reference for correctness check."""
    hs = [f @ w + b for f, w, b in zip(features, params['mod_w'], params['mod_b'])]
    xc = jnp.concatenate(hs, axis=-1)
    x = jax.nn.relu(xc @ params['w2'] + params['b2'])
    return x @ params['wf'] + params['bf']


if __name__ == "__main__":
    key = jax.random.PRNGKey(0)

    # Two modalities, as implied by the module's list-of-[dim] input_size arg.
    input_sizes = [32, 16]   # i.e. module input_size = [[32], [16]]
    output_size = 8
    batch = 4

    k_params, k_x0, k_x1 = jax.random.split(key, 3)
    params = init_params(k_params, input_sizes, output_size)

    features = [
        jax.random.normal(k_x0, (batch, input_sizes[0]), jnp.float32),
        jax.random.normal(k_x1, (batch, input_sizes[1]), jnp.float32),
    ]

    out = intermediate_fusion_forward(features, params)
    out = jax.block_until_ready(out)

    ref = reference_forward(features, params)
    assert out.shape == (batch, output_size)
    # bf16 inputs/weights with f32 accumulation -> loose-but-safe tolerance vs f32 ref
    assert jnp.allclose(out, ref, atol=2e-2, rtol=2e-2), "mismatch vs reference"

    print("KERNEL_OK")
</pallas_src>

<mosaic_0001>
module attributes {stable_mosaic.version = 11 : i64} {
  func.func @_fusion_kernel(%arg0: i32, %arg1: memref<8x32xbf16, #tpu.memory_space<vmem>>, %arg2: memref<32x128xbf16, #tpu.memory_space<vmem>>, %arg3: memref<8x16xbf16, #tpu.memory_space<vmem>>, %arg4: memref<16x128xbf16, #tpu.memory_space<vmem>>, %arg5: memref<1x128xf32, #tpu.memory_space<vmem>>, %arg6: memref<128x128xbf16, #tpu.memory_space<vmem>>, %arg7: memref<1x128xf32, #tpu.memory_space<vmem>>, %arg8: memref<8x128xf32, #tpu.memory_space<vmem>>) attributes {dimension_semantics = [#tpu.dimension_semantics<parallel>], iteration_bounds = array<i64: 1>, scalar_prefetch = 0 : i64, scratch_operands = 0 : i64, tpu.core_type = #tpu.core_type<tc>, window_params = [{transform_indices = @transform_0, window_bounds = array<i64: 8, 32>}, {pipeline_mode = #tpu.pipeline_mode<synchronous>, transform_indices = @transform_1, window_bounds = array<i64: 32, 128>}, {transform_indices = @transform_2, window_bounds = array<i64: 8, 16>}, {pipeline_mode = #tpu.pipeline_mode<synchronous>, transform_indices = @transform_3, window_bounds = array<i64: 16, 128>}, {pipeline_mode = #tpu.pipeline_mode<synchronous>, transform_indices = @transform_4, window_bounds = array<i64: 1, 128>}, {pipeline_mode = #tpu.pipeline_mode<synchronous>, transform_indices = @transform_5, window_bounds = array<i64: 128, 128>}, {pipeline_mode = #tpu.pipeline_mode<synchronous>, transform_indices = @transform_6, window_bounds = array<i64: 1, 128>}, {transform_indices = @transform_7, window_bounds = array<i64: 8, 128>}]} {
    %c0 = arith.constant 0 : index
    %c0_0 = arith.constant 0 : index
    %0 = vector.load %arg1[%c0, %c0_0] : memref<8x32xbf16, #tpu.memory_space<vmem>>, vector<8x32xbf16>
    %c0_1 = arith.constant 0 : index
    %c0_2 = arith.constant 0 : index
    %1 = vector.load %arg2[%c0_1, %c0_2] : memref<32x128xbf16, #tpu.memory_space<vmem>>, vector<32x128xbf16>
    %cst = arith.constant dense<0.000000e+00> : vector<8x128xf32>
    %2 = tpu.matmul %0, %1, %cst {dimension_numbers = #tpu.dot_dimension_numbers<[1], [0], [0], [1], [0, 0, 1, 1], [], []>} : vector<8x32xbf16>, vector<32x128xbf16>, vector<8x128xf32> -> vector<8x128xf32>
    %c0_3 = arith.constant 0 : index
    %c0_4 = arith.constant 0 : index
    %3 = vector.load %arg3[%c0_3, %c0_4] : memref<8x16xbf16, #tpu.memory_space<vmem>>, vector<8x16xbf16>
    %c0_5 = arith.constant 0 : index
    %c0_6 = arith.constant 0 : index
    %4 = vector.load %arg4[%c0_5, %c0_6] : memref<16x128xbf16, #tpu.memory_space<vmem>>, vector<16x128xbf16>
    %cst_7 = arith.constant dense<0.000000e+00> : vector<8x128xf32>
    %5 = tpu.matmul %3, %4, %cst_7 {dimension_numbers = #tpu.dot_dimension_numbers<[1], [0], [0], [1], [0, 0, 1, 1], [], []>} : vector<8x16xbf16>, vector<16x128xbf16>, vector<8x128xf32> -> vector<8x128xf32>
    %6 = arith.addf %2, %5 : vector<8x128xf32>
    %c0_8 = arith.constant 0 : index
    %c0_9 = arith.constant 0 : index
    %7 = vector.load %arg5[%c0_8, %c0_9] : memref<1x128xf32, #tpu.memory_space<vmem>>, vector<1x128xf32>
    %8 = vector.broadcast %7 : vector<1x128xf32> to vector<8x128xf32>
    %9 = arith.addf %6, %8 : vector<8x128xf32>
    %cst_10 = arith.constant 0.000000e+00 : f32
    %10 = vector.broadcast %cst_10 : f32 to vector<8x128xf32>
    %11 = arith.maximumf %9, %10 : vector<8x128xf32>
    %12 = arith.truncf %11 : vector<8x128xf32> to vector<8x128xbf16>
    %c0_11 = arith.constant 0 : index
    %c0_12 = arith.constant 0 : index
    %13 = vector.load %arg6[%c0_11, %c0_12] : memref<128x128xbf16, #tpu.memory_space<vmem>>, vector<128x128xbf16>
    %cst_13 = arith.constant dense<0.000000e+00> : vector<8x128xf32>
    %14 = tpu.matmul %12, %13, %cst_13 {dimension_numbers = #tpu.dot_dimension_numbers<[1], [0], [0], [1], [0, 0, 1, 1], [], []>} : vector<8x128xbf16>, vector<128x128xbf16>, vector<8x128xf32> -> vector<8x128xf32>
    %c0_14 = arith.constant 0 : index
    %c0_15 = arith.constant 0 : index
    %15 = vector.load %arg7[%c0_14, %c0_15] : memref<1x128xf32, #tpu.memory_space<vmem>>, vector<1x128xf32>
    %16 = vector.broadcast %15 : vector<1x128xf32> to vector<8x128xf32>
    %17 = arith.addf %14, %16 : vector<8x128xf32>
    %c0_16 = arith.constant 0 : index
    %c0_17 = arith.constant 0 : index
    %18 = vector.load %arg8[%c0_16, %c0_17] : memref<8x128xf32, #tpu.memory_space<vmem>>, vector<8x128xf32>
    tpu.vector_store %arg8[%c0_16, %c0_17], %17 {strides = array<i32>} : memref<8x128xf32, #tpu.memory_space<vmem>>, vector<8x128xf32>,
    return
  }
  func.func @transform_0(%arg0: i32) -> (i32, i32) {
    %c0_i32 = arith.constant 0 : i32
    %c0_i32_0 = arith.constant 0 : i32
    return %arg0, %c0_i32 : i32, i32
  }
  func.func @transform_1(%arg0: i32) -> (i32, i32) {
    %c0_i32 = arith.constant 0 : i32
    %c0_i32_0 = arith.constant 0 : i32
    %c0_i32_1 = arith.constant 0 : i32
    return %c0_i32, %c0_i32_0 : i32, i32
  }
  func.func @transform_2(%arg0: i32) -> (i32, i32) {
    %c0_i32 = arith.constant 0 : i32
    %c0_i32_0 = arith.constant 0 : i32
    return %arg0, %c0_i32 : i32, i32
  }
  func.func @transform_3(%arg0: i32) -> (i32, i32) {
    %c0_i32 = arith.constant 0 : i32
    %c0_i32_0 = arith.constant 0 : i32
    %c0_i32_1 = arith.constant 0 : i32
    return %c0_i32, %c0_i32_0 : i32, i32
  }
  func.func @transform_4(%arg0: i32) -> (i32, i32) {
    %c0_i32 = arith.constant 0 : i32
    %c0_i32_0 = arith.constant 0 : i32
    %c0_i32_1 = arith.constant 0 : i32
    return %c0_i32, %c0_i32_0 : i32, i32
  }
  func.func @transform_5(%arg0: i32) -> (i32, i32) {
    %c0_i32 = arith.constant 0 : i32
    %c0_i32_0 = arith.constant 0 : i32
    %c0_i32_1 = arith.constant 0 : i32
    return %c0_i32, %c0_i32_0 : i32, i32
  }
  func.func @transform_6(%arg0: i32) -> (i32, i32) {
    %c0_i32 = arith.constant 0 : i32
    %c0_i32_0 = arith.constant 0 : i32
    %c0_i32_1 = arith.constant 0 : i32
    return %c0_i32, %c0_i32_0 : i32, i32
  }
  func.func @transform_7(%arg0: i32) -> (i32, i32) {
    %c0_i32 = arith.constant 0 : i32
    %c0_i32_0 = arith.constant 0 : i32
    return %arg0, %c0_i32 : i32, i32
  }
}

</mosaic_0001>

<bundles_post_ra>
// kernel: tpu_custom_call.1
= control target key start
LH: loop header
LB: loop body
LE: loop exit
PB: predicated region body
PF: predicated region fallthrough
CT: control target
= control target key end

     0   :  { %12 = vsyncpa [#allocation3], 0  ;;  %s657_s0 = inlined_call_operand.hbm [shape: bf16[8,32], index: 0, kind: input, shape index: {}]   ;;  %s658_s1 = inlined_call_operand.hbm [shape: bf16[32,128], index: 1, kind: input, shape index: {}]   ;;  %s659_s2 = inlined_call_operand.hbm [shape: bf16[8,16], index: 2, kind: input, shape index: {}]   ;;  %s660_s3 = inlined_call_operand.vmem [shape: bf16[16,128], index: 3, kind: input, shape index: {}]   ;;  %s661_s4 = inlined_call_operand.vmem [shape: f32[1,128], index: 4, kind: input, shape index: {}]   ;;  %s662_s5 = inlined_call_operand.hbm [shape: bf16[128,128], index: 5, kind: input, shape index: {}]   ;;  %s663_s6 = inlined_call_operand.vmem [shape: f32[1,128], index: 6, kind: input, shape index: {}]   ;;  %s664_s7 = inlined_call_operand.hbm [shape: f32[8,128], index: 7, kind: output, shape index: {}]  }
   0x1   :  { %13 = vsyncpa [#allocation6], 0 }
   0x2   :  { %14 = vsyncpa [#allocation9], 0 }
   0x3   :  { %15 = vsyncpa [#allocation4], 0  ;;  %s533_s24 = smov [#allocation5]   ;;  %s415_s28 = scalar_lea.hbm %s658_s1, 256 }
   0x4   :  { %s31_s25 = sshll.u32 %s533_s24, 4  ;;  %p416_p0 = scmp.ne.s32.totalorder %s658_s1, %s415_s28  ;;  %s32_s25 = int_to_ptr.vmem [resolvable:$true] %s31_s25 }
   0x5   :  { %p419_p1 = scmp.lt.u32.totalorder %s415_s28, %s658_s1 }
   0x7   :  { %p421_p2 = pnand %p419_p1, %p416_p0 }
   0x9   :  { %424 = shalt.err (!%p421_p2)
}
   0xa   :  { %s425_s10 = scalar_lea.vmem %s32_s25, 256  ;;  %p430_p4 = scmp.lt.s32.totalorder %s32_s25, %s32_s25 }
   0xb   :  { %p426_p3 = scmp.ne.s32.totalorder %s32_s25, %s425_s10  ;;  %p431_p5 = scmp.lt.s32.totalorder %s425_s10, %s425_s10 }
   0xd   :  { %p432_p6 = por %p431_p5, %p430_p4 }
   0xf   :  { %p433_p7 = pnand %p432_p6, %p426_p3 }
  0x11   :  { %436 = shalt.err (!%p433_p7)
}
  0x12   :  { %s534_s11 = smov 64   ;;  %s535_s12 = smov 4  }
  0x13   :  { %37 = dma.hbm_to_vmem [thread:$0]  %s658_s1, 256, %s32_s25, [#allocation6], %s534_s11, %s534_s11, %s535_s12  }
  0x14   :  { %s536_s15 = smov [#allocation2]   ;;  %s537_s17 = smov [#allocation7]  }
  0x15   :  { %s22_s16 = sshll.u32 %s536_s15, 4  ;;  %s44_s18 = sshll.u32 %s537_s17, 4  ;;  %s23_s16 = int_to_ptr.vmem [resolvable:$true] %s22_s16  ;;  %s45_s18 = int_to_ptr.vmem [resolvable:$true] %s44_s18 }
  0x16   :  { %s437_s21 = scalar_lea.hbm %s657_s0, 64 }
  0x17   :  { %p438_p8 = scmp.ne.s32.totalorder %s657_s0, %s437_s21  ;;  %p441_p9 = scmp.lt.u32.totalorder %s437_s21, %s657_s0 }
  0x19   :  { %p443_p10 = pnand %p441_p9, %p438_p8 }
  0x1b   :  { %446 = shalt.err (!%p443_p10)
}
  0x1c   :  { %s447_s1 = scalar_lea.vmem %s23_s16, 64  ;;  %p452_p12 = scmp.lt.s32.totalorder %s23_s16, %s23_s16 }
  0x1d   :  { %p448_p11 = scmp.ne.s32.totalorder %s23_s16, %s447_s1  ;;  %p453_p13 = scmp.lt.s32.totalorder %s447_s1, %s447_s1 }
  0x1f   :  { %p454_p0 = por %p453_p13, %p452_p12 }
  0x21   :  { %p455_p1 = pnand %p454_p0, %p448_p11 }
  0x23   :  { %458 = shalt.err (!%p455_p1)
}
  0x24   :  { %25 = dma.hbm_to_vmem [thread:$0]  %s657_s0, 64, %s23_s16, [#allocation3]  }
  0x25   :  { %s459_s30 = scalar_lea.hbm %s659_s2, 64 }
  0x26   :  { %p460_p2 = scmp.ne.s32.totalorder %s659_s2, %s459_s30  ;;  %p463_p3 = scmp.lt.u32.totalorder %s459_s30, %s659_s2 }
  0x28   :  { %p465_p4 = pnand %p463_p3, %p460_p2 }
  0x2a   :  { %468 = shalt.err (!%p465_p4)
}
  0x2b   :  { %s469_s14 = scalar_lea.vmem %s45_s18, 64  ;;  %p474_p6 = scmp.lt.s32.totalorder %s45_s18, %s45_s18 }
  0x2c   :  { %p470_p5 = scmp.ne.s32.totalorder %s45_s18, %s469_s14  ;;  %p475_p7 = scmp.lt.s32.totalorder %s469_s14, %s469_s14 }
  0x2e   :  { %p476_p8 = por %p475_p7, %p474_p6 }
  0x30   :  { %p477_p9 = pnand %p476_p8, %p470_p5 }
  0x32   :  { %480 = shalt.err (!%p477_p9)
}
  0x33   :  { %47 = dma.hbm_to_vmem [thread:$0]  %s659_s2, 64, %s45_s18, [#allocation6]  }
  0x34   :  { %s538_s16 = smov [#allocation8]   ;;  %s481_s21 = scalar_lea.hbm %s662_s5, 1024 }
  0x35   :  { %s57_s17 = sshll.u32 %s538_s16, 4  ;;  %p482_p10 = scmp.ne.s32.totalorder %s662_s5, %s481_s21  ;;  %s58_s17 = int_to_ptr.vmem [resolvable:$true] %s57_s17 }
  0x36   :  { %p485_p11 = scmp.lt.u32.totalorder %s481_s21, %s662_s5 }
  0x38   :  { %p487_p12 = pnand %p485_p11, %p482_p10 }
  0x3a   :  { %490 = shalt.err (!%p487_p12)
}
  0x3b   :  { %s491_s1 = scalar_lea.vmem %s58_s17, 1024  ;;  %p496_p0 = scmp.lt.s32.totalorder %s58_s17, %s58_s17 }
  0x3c   :  { %p492_p13 = scmp.ne.s32.totalorder %s58_s17, %s491_s1  ;;  %p497_p1 = scmp.lt.s32.totalorder %s491_s1, %s491_s1 }
  0x3e   :  { %p498_p2 = por %p497_p1, %p496_p0 }
  0x40   :  { %p499_p3 = pnand %p498_p2, %p492_p13 }
  0x42   :  { %502 = shalt.err (!%p499_p3)
}
  0x43   :  { %63 = dma.hbm_to_vmem [thread:$0]  %s662_s5, 1024, %s58_s17, [#allocation9], %s534_s11, %s534_s11, %s535_s12  }
  0x44   :  { %525 = dma.done.wait [#allocation3], 64  }
  0x45   :  { %526 = vsyncadd [#allocation3], 4294967232 }
  0x46   :  { %527 = dma.done.wait [#allocation6], 320  }
  0x47   :  { %528 = vsyncadd [#allocation6], 4294966976 }
  0x48   :  { %529 = dma.done.wait [#allocation9], 1024  }
  0x49   :  { %530 = vsyncadd [#allocation9], 4294966272  ;;  %v539_v0 = vmov 0.0   ;;  %vm540_vm0 = vmmov 0   ;;  %v404_v1 = vld [vmem:[%s660_s3] sm:$0xff]   ;;  %vm93_vm1 = vcmask 130048  }
  0x4a   :  { %361 = vmatprep.subr.bf16.mxu1 %v539_v0  ;;  %363 = vmatprep.mubr.msk.bf16.mxu1 %vm540_vm0, %v539_v0  ;;  %v84_v2 = vld [vmem:[#allocation7] sm:$0xf]  ;;  %v405_v3 = vld [vmem:[#allocation5] sm:$0xff]   ;;  %v407_v4 = vld [vmem:[#allocation8] sm:$0xff]   ;;  %vm149_vm2 = vcmask 261120   ;;  %s541_s28 = smov [#allocation10]  }
  0x4b   :  { %375 = vmatprep.subr.bf16.mxu0 %v539_v0  ;;  %391 = vmatprep.mubr.msk.bf16.mxu0 %vm540_vm0, %v539_v0  ;;  %v406_v5 = vld [vmem:[#allocation5 + $0x8] sm:$0xff]   ;;  %v408_v6 = vld [vmem:[#allocation8 + $0x8] sm:$0xff]   ;;  %v411_v10 = vld [vmem:[#allocation8 + $0x20] sm:$0xff]   ;;  %s321_s29 = sshll.u32 %s541_s28, 4  ;;  %s322_s29 = int_to_ptr.vmem [resolvable:$true] %s321_s29 }
  0x4c   :  { %362 = vmatpush3.bf16.msra.mxu1 %v404_v1  ;;  %376 = vmatpush3.bf16.msra.mxu0 %v407_v4  ;;  %v79_v7 = vld [vmem:[#allocation2] sm:$0xf]  ;;  %v409_v8 = vld [vmem:[#allocation8 + $0x10] sm:$0xff]   ;;  %v410_v9 = vld [vmem:[#allocation8 + $0x18] sm:$0xff]   ;;  %p508_p5 = scmp.lt.s32.totalorder %s322_s29, %s322_s29 }
  0x4d   :  { %367 = vmatprep.subr.bf16.mxu1 %v539_v0  ;;  %377 = vmatprep.subr.bf16.mxu0 %v539_v0  ;;  %v412_v11 = vld [vmem:[#allocation8 + $0x28] sm:$0xff]   ;;  %v413_v12 = vld [vmem:[#allocation8 + $0x30] sm:$0xff]   ;;  %v414_v13 = vld [vmem:[#allocation8 + $0x38] sm:$0xff]  }
  0x4e   :  { %v337_v19 = vld [vmem:[%s661_s4] ss:$0 sm:$0xff]  ;;  %s503_s4 = scalar_lea.vmem %s322_s29, 128 }
  0x4f   :  { %364 = vmatmul.mubr.msk.bf16.vlgmr.msra.gmra.mrb[0].mxu1 %vm93_vm1, %v84_v2  ;;  %v338_v27 = vld [vmem:[%s663_s6] ss:$0 sm:$0xff]  ;;  %p504_p4 = scmp.ne.s32.totalorder %s322_s29, %s503_s4  ;;  %p509_p6 = scmp.lt.s32.totalorder %s503_s4, %s503_s4 }
  0x50   :  { %368 = vmatpush3.bf16.msra.mxu1 %v405_v3  ;;  %371 = vmatprep.mubr.msk.bf16.mxu1 %vm540_vm0, %v539_v0 }
  0x51   :  { %369 = vmatprep.subr.bf16.mxu1 %v539_v0  ;;  %378 = vmatpush3.bf16.msra.mxu0 %v408_v6  ;;  %p510_p7 = por %p509_p6, %p508_p5 }
  0x52   :  { %379 = vmatprep.subr.bf16.mxu0 %v539_v0 }
  0x53   :  { %p511_p8 = pnand %p510_p7, %p504_p4 }
  0x54   :  { %370 = vmatpush3.bf16.msra.mxu1 %v406_v5 }
  0x55   :  { %380 = vmatpush3.bf16.msra.mxu0 %v409_v8 }
  0x56   :  { %381 = vmatprep.subr.bf16.mxu0 %v539_v0 }
  0x57   :  { %372 = vmatmul.mubr.msk.bf16.vlgmr.msra.gmra.mrb[4].mxu1 %vm149_vm2, %v79_v7 }
  0x59   :  { %382 = vmatpush3.bf16.msra.mxu0 %v410_v9 }
  0x5a   :  { %383 = vmatprep.subr.bf16.mxu0 %v539_v0 }
  0x5d   :  { %384 = vmatpush3.bf16.msra.mxu0 %v411_v10 }
  0x5e   :  { %385 = vmatprep.subr.bf16.mxu0 %v539_v0 }
  0x61   :  { %386 = vmatpush3.bf16.msra.mxu0 %v412_v11 }
  0x62   :  { %387 = vmatprep.subr.bf16.mxu0 %v539_v0 }
  0x65   :  { %388 = vmatpush3.bf16.msra.mxu0 %v413_v12 }
  0x66   :  { %389 = vmatprep.subr.bf16.mxu0 %v539_v0 }
  0x69   :  { %390 = vmatpush3.bf16.msra.mxu0 %v414_v13 }
 0x122   :  { %v131_v14 = vpop.f32.mrb[0].mxu1 }
 0x123   :  { %v365_v15 = vpop.f32.mrb[1].mxu1 }
 0x124   :  { %v134_v16 = vpop.f32.mrb[2].mxu1 }
 0x125   :  { %v366_v17 = vpop.f32.mrb[3].mxu1 }
 0x12a   :  { %v187_v18 = vpop.f32.mrb[4].mxu1 }
 0x12b   :  { %v188_v20 = vadd.f32 %v187_v18, %v131_v14  ;;  %v373_v21 = vpop.f32.mrb[5].mxu1 }
 0x12c   :  { %v190_v22 = vpop.f32.mrb[6].mxu1 }
 0x12d   :  { %v200_v23 = vadd.f32 %v337_v19, %v188_v20  ;;  %v374_v24 = vpop.f32.mrb[7].mxu1 }
 0x12f   :  { %v201_v25 = vmax.f32 %v200_v23, 0.0 }
 0x131   :  { %v202_v26 = vpack.c.bf16 %v201_v25, %v201_v25 }
 0x133   :  { %392 = vmatmul.mubr.bf16.vlgmr.msra.gmra.mrb[0].mxu0 %v202_v26 }
 0x206   :  { %v308_v28 = vpop.f32.mrb[0].mxu0 }
 0x207   :  { %v309_v29 = vadd.f32 %v338_v27, %v308_v28  ;;  %v393_v30 = vpop.f32.mrb[1].mxu0 }
 0x208   :  { %v311_v31 = vpop.f32.mrb[2].mxu0 }
 0x209   :  { %314 = vst [vmem:[#allocation10] sm:$0xff] %v309_v29  ;;  %v394_v32 = vpop.f32.mrb[3].mxu0 }
 0x20a   :  { %514 = shalt.err (!%p511_p8)
}
 0x20b   :  { %s515_s6 = scalar_lea.hbm %s664_s7, 128 }
 0x20c   :  { %p516_p9 = scmp.ne.s32.totalorder %s664_s7, %s515_s6  ;;  %p519_p10 = scmp.lt.u32.totalorder %s515_s6, %s664_s7 }
 0x20e   :  { %p521_p11 = pnand %p519_p10, %p516_p9 }
 0x210   :  { %524 = shalt.err (!%p521_p11)
}
 0x211   :  { %324 = dma.vmem_to_hbm [thread:$0]  %s322_s29, 128, %s664_s7, [#allocation4]  }
 0x212   :  { %531 = dma.done.wait [#allocation4], 128  }
 0x213   :  { %532 = vsyncadd [#allocation4], 4294967168 }
 0x214   :  { %328 = vsyncpa [#allocation3], 1 }
 0x215   :  { %329 = vsyncpa [#allocation6], 1 }
 0x216   :  { %330 = vsyncpa [#allocation9], 1 }
 0x217   :  { %331 = vsyncpa [#allocation4], 1 }

</bundles_post_ra>
